<compile_context>
chip_gen: v7x
topology: tpu7x:2x2x1
jax: 0.10.0
libtpu: 0.0.40
codegen_flags: <defaults>
</compile_context>

<pallas_src>
import jax
import jax.numpy as jnp
from jax.experimental import pallas as pl
from jax.experimental.pallas import tpu as pltpu

_NOUT = 128  # lane-dense packed output width (y, y1, y2 live in columns 0..2)


def _cf_kernel(sim_ref, com_ref, w_sim_ref, w_com_ref, bias_ref, out_ref):
    # out[:, 0] = sim @ wf_s + com @ wf_c + bf   (fc on concat)
    # out[:, 1] = sim @ w1               + b1    (fc1 on sim)
    # out[:, 2] =               com @ w2 + b2    (fc2 on com)
    out = (jnp.dot(sim_ref[...], w_sim_ref[...],
                   preferred_element_type=jnp.float32)
           + jnp.dot(com_ref[...], w_com_ref[...],
                     preferred_element_type=jnp.float32)
           + bias_ref[...])
    out_ref[...] = out.astype(out_ref.dtype)


def cf_forward(sim, com, params, *, batch_tile=1024):
    """Runs the CF head. sim: (B, Ds), com: (B, Dc) float32.

    Returns (y, y1, y2), each (B, 1) float32.
    """
    B, Ds = sim.shape
    _, Dc = com.shape

    wf, bf, w1, b1, w2, b2 = (params["wf"], params["bf"],
                              params["w1"], params["b1"],
                              params["w2"], params["b2"])

    # Host-side weight packing (tiny, done once per call / folded by XLA).
    # PyTorch nn.Linear weight is (out=1, in); take row 0.
    w_sim = jnp.zeros((Ds, _NOUT), jnp.float32)
    w_sim = w_sim.at[:, 0].set(wf[0, :Ds]).at[:, 1].set(w1[0, :])
    w_com = jnp.zeros((Dc, _NOUT), jnp.float32)
    w_com = w_com.at[:, 0].set(wf[0, Ds:]).at[:, 2].set(w2[0, :])
    bias_row = jnp.zeros((1, _NOUT), jnp.float32)
    bias_row = bias_row.at[0, 0].set(bf[0]).at[0, 1].set(b1[0]).at[0, 2].set(b2[0])

    # Batch tiling: use the whole batch if it's small, otherwise a multiple-of-8
    # tile that double-buffers comfortably within VMEM on v5e/v6e/v7x.
    tb = B if B <= batch_tile else batch_tile
    grid = (pl.cdiv(B, tb),)

    out_packed = pl.pallas_call(
        _cf_kernel,
        out_shape=jax.ShapeDtypeStruct((B, _NOUT), jnp.float32),
        grid=grid,
        in_specs=[
            pl.BlockSpec((tb, Ds), lambda i: (i, 0)),      # sim tile
            pl.BlockSpec((tb, Dc), lambda i: (i, 0)),      # com tile
            pl.BlockSpec((Ds, _NOUT), lambda i: (0, 0)),   # packed sim weights (resident)
            pl.BlockSpec((Dc, _NOUT), lambda i: (0, 0)),   # packed com weights (resident)
            pl.BlockSpec((1, _NOUT), lambda i: (0, 0)),    # packed bias row (resident)
        ],
        out_specs=pl.BlockSpec((tb, _NOUT), lambda i: (i, 0)),
        compiler_params=pltpu.CompilerParams(
            dimension_semantics=("parallel",)),
    )(sim, com, w_sim, w_com, bias_row)

    # Free slices in the wrapper (lane-dense store happened in-kernel).
    y = out_packed[:, 0:1]
    y1 = out_packed[:, 1:2]
    y2 = out_packed[:, 2:3]
    return y, y1, y2


def init_params(key, sim_dim, com_dim):
    """Deterministic synthetic parameters matching nn.Linear shapes."""
    k = jax.random.split(key, 6)
    tot = sim_dim + com_dim

    def u(kk, shape, fan_in):
        bound = 1.0 / jnp.sqrt(fan_in)
        return jax.random.uniform(kk, shape, jnp.float32, -bound, bound)

    return {
        "wf": u(k[0], (1, tot), tot), "bf": u(k[1], (1,), tot),
        "w1": u(k[2], (1, sim_dim), sim_dim), "b1": u(k[3], (1,), sim_dim),
        "w2": u(k[4], (1, com_dim), com_dim), "b2": u(k[5], (1,), com_dim),
    }


def _reference(sim, com, p):
    total = jnp.concatenate([sim, com], axis=-1)
    y = total @ p["wf"].T + p["bf"]
    y1 = sim @ p["w1"].T + p["b1"]
    y2 = com @ p["w2"].T + p["b2"]
    return y, y1, y2


if __name__ == "__main__":
    B, SIM_DIM, COM_DIM = 8, 32, 48
    key = jax.random.PRNGKey(0)
    k_sim, k_com, k_par = jax.random.split(key, 3)

    sim = jax.random.normal(k_sim, (B, SIM_DIM), jnp.float32)
    com = jax.random.normal(k_com, (B, COM_DIM), jnp.float32)
    params = init_params(k_par, SIM_DIM, COM_DIM)

    y, y1, y2 = jax.block_until_ready(cf_forward(sim, com, params))

    ry, ry1, ry2 = _reference(sim, com, params)
    assert y.shape == (B, 1) and y1.shape == (B, 1) and y2.shape == (B, 1)
    assert jnp.allclose(y, ry, atol=1e-5)
    assert jnp.allclose(y1, ry1, atol=1e-5)
    assert jnp.allclose(y2, ry2, atol=1e-5)

    print("KERNEL_OK")
</pallas_src>

<mosaic_0001>
module attributes {stable_mosaic.version = 11 : i64} {
  func.func @_cf_kernel(%arg0: i32, %arg1: memref<8x32xf32, #tpu.memory_space<vmem>>, %arg2: memref<8x48xf32, #tpu.memory_space<vmem>>, %arg3: memref<32x128xf32, #tpu.memory_space<vmem>>, %arg4: memref<48x128xf32, #tpu.memory_space<vmem>>, %arg5: memref<1x128xf32, #tpu.memory_space<vmem>>, %arg6: memref<8x128xf32, #tpu.memory_space<vmem>>) attributes {dimension_semantics = [#tpu.dimension_semantics<parallel>], iteration_bounds = array<i64: 1>, scalar_prefetch = 0 : i64, scratch_operands = 0 : i64, tpu.core_type = #tpu.core_type<tc>, window_params = [{transform_indices = @transform_0, window_bounds = array<i64: 8, 32>}, {transform_indices = @transform_1, window_bounds = array<i64: 8, 48>}, {pipeline_mode = #tpu.pipeline_mode<synchronous>, transform_indices = @transform_2, window_bounds = array<i64: 32, 128>}, {pipeline_mode = #tpu.pipeline_mode<synchronous>, transform_indices = @transform_3, window_bounds = array<i64: 48, 128>}, {pipeline_mode = #tpu.pipeline_mode<synchronous>, transform_indices = @transform_4, window_bounds = array<i64: 1, 128>}, {transform_indices = @transform_5, window_bounds = array<i64: 8, 128>}]} {
    %c0 = arith.constant 0 : index
    %c0_0 = arith.constant 0 : index
    %0 = vector.load %arg1[%c0, %c0_0] : memref<8x32xf32, #tpu.memory_space<vmem>>, vector<8x32xf32>
    %c0_1 = arith.constant 0 : index
    %c0_2 = arith.constant 0 : index
    %1 = vector.load %arg3[%c0_1, %c0_2] : memref<32x128xf32, #tpu.memory_space<vmem>>, vector<32x128xf32>
    %cst = arith.constant dense<0.000000e+00> : vector<8x128xf32>
    %2 = tpu.matmul %0, %1, %cst {dimension_numbers = #tpu.dot_dimension_numbers<[1], [0], [0], [1], [0, 0, 1, 1], [], []>} : vector<8x32xf32>, vector<32x128xf32>, vector<8x128xf32> -> vector<8x128xf32>
    %c0_3 = arith.constant 0 : index
    %c0_4 = arith.constant 0 : index
    %3 = vector.load %arg2[%c0_3, %c0_4] : memref<8x48xf32, #tpu.memory_space<vmem>>, vector<8x48xf32>
    %c0_5 = arith.constant 0 : index
    %c0_6 = arith.constant 0 : index
    %4 = vector.load %arg4[%c0_5, %c0_6] : memref<48x128xf32, #tpu.memory_space<vmem>>, vector<48x128xf32>
    %cst_7 = arith.constant dense<0.000000e+00> : vector<8x128xf32>
    %5 = tpu.matmul %3, %4, %cst_7 {dimension_numbers = #tpu.dot_dimension_numbers<[1], [0], [0], [1], [0, 0, 1, 1], [], []>} : vector<8x48xf32>, vector<48x128xf32>, vector<8x128xf32> -> vector<8x128xf32>
    %6 = arith.addf %2, %5 : vector<8x128xf32>
    %c0_8 = arith.constant 0 : index
    %c0_9 = arith.constant 0 : index
    %7 = vector.load %arg5[%c0_8, %c0_9] : memref<1x128xf32, #tpu.memory_space<vmem>>, vector<1x128xf32>
    %8 = vector.broadcast %7 : vector<1x128xf32> to vector<8x128xf32>
    %9 = arith.addf %6, %8 : vector<8x128xf32>
    %c0_10 = arith.constant 0 : index
    %c0_11 = arith.constant 0 : index
    %10 = vector.load %arg6[%c0_10, %c0_11] : memref<8x128xf32, #tpu.memory_space<vmem>>, vector<8x128xf32>
    tpu.vector_store %arg6[%c0_10, %c0_11], %9 {strides = array<i32>} : memref<8x128xf32, #tpu.memory_space<vmem>>, vector<8x128xf32>,
    return
  }
  func.func @transform_0(%arg0: i32) -> (i32, i32) {
    %c0_i32 = arith.constant 0 : i32
    %c0_i32_0 = arith.constant 0 : i32
    return %arg0, %c0_i32 : i32, i32
  }
  func.func @transform_1(%arg0: i32) -> (i32, i32) {
    %c0_i32 = arith.constant 0 : i32
    %c0_i32_0 = arith.constant 0 : i32
    return %arg0, %c0_i32 : i32, i32
  }
  func.func @transform_2(%arg0: i32) -> (i32, i32) {
    %c0_i32 = arith.constant 0 : i32
    %c0_i32_0 = arith.constant 0 : i32
    %c0_i32_1 = arith.constant 0 : i32
    return %c0_i32, %c0_i32_0 : i32, i32
  }
  func.func @transform_3(%arg0: i32) -> (i32, i32) {
    %c0_i32 = arith.constant 0 : i32
    %c0_i32_0 = arith.constant 0 : i32
    %c0_i32_1 = arith.constant 0 : i32
    return %c0_i32, %c0_i32_0 : i32, i32
  }
  func.func @transform_4(%arg0: i32) -> (i32, i32) {
    %c0_i32 = arith.constant 0 : i32
    %c0_i32_0 = arith.constant 0 : i32
    %c0_i32_1 = arith.constant 0 : i32
    return %c0_i32, %c0_i32_0 : i32, i32
  }
  func.func @transform_5(%arg0: i32) -> (i32, i32) {
    %c0_i32 = arith.constant 0 : i32
    %c0_i32_0 = arith.constant 0 : i32
    return %arg0, %c0_i32 : i32, i32
  }
}

</mosaic_0001>

<bundles_post_ra>
// kernel: tpu_custom_call.1
= control target key start
LH: loop header
LB: loop body
LE: loop exit
PB: predicated region body
PF: predicated region fallthrough
CT: control target
= control target key end

     0   :  { %10 = vsyncpa [#allocation3], 0  ;;  %s545_s0 = inlined_call_operand.hbm [shape: f32[8,32], index: 0, kind: input, shape index: {}]   ;;  %s546_s1 = inlined_call_operand.hbm [shape: f32[8,48], index: 1, kind: input, shape index: {}]   ;;  %s547_s2 = inlined_call_operand.hbm [shape: f32[32,128], index: 2, kind: input, shape index: {}]   ;;  %s548_s3 = inlined_call_operand.hbm [shape: f32[48,128], index: 3, kind: input, shape index: {}]   ;;  %s549_s4 = inlined_call_operand.vmem [shape: f32[1,128], index: 4, kind: input, shape index: {}]   ;;  %s550_s5 = inlined_call_operand.hbm [shape: f32[8,128], index: 5, kind: output, shape index: {}]  }
   0x1   :  { %11 = vsyncpa [#allocation6], 0 }
   0x2   :  { %12 = vsyncpa [#allocation9], 0 }
   0x3   :  { %13 = vsyncpa [#allocation4], 0  ;;  %s442_s18 = smov [#allocation5]   ;;  %s443_s20 = smov [#allocation2]  }
   0x4   :  { %s30_s19 = sshll.u32 %s442_s18, 4  ;;  %s20_s21 = sshll.u32 %s443_s20, 4  ;;  %s31_s19 = int_to_ptr.vmem [resolvable:$true] %s30_s19  ;;  %s21_s21 = int_to_ptr.vmem [resolvable:$true] %s20_s21 }
   0x5   :  { %s324_s24 = scalar_lea.hbm %s546_s1, 128 }
   0x6   :  { %p325_p0 = scmp.ne.s32.totalorder %s546_s1, %s324_s24  ;;  %p328_p1 = scmp.lt.u32.totalorder %s324_s24, %s546_s1 }
   0x8   :  { %p330_p2 = pnand %p328_p1, %p325_p0 }
   0xa   :  { %333 = shalt.err (!%p330_p2)
}
   0xb   :  { %s334_s29 = scalar_lea.vmem %s31_s19, 128  ;;  %p339_p4 = scmp.lt.s32.totalorder %s31_s19, %s31_s19 }
   0xc   :  { %p335_p3 = scmp.ne.s32.totalorder %s31_s19, %s334_s29  ;;  %p340_p5 = scmp.lt.s32.totalorder %s334_s29, %s334_s29 }
   0xe   :  { %p341_p6 = por %p340_p5, %p339_p4 }
  0x10   :  { %p342_p7 = pnand %p341_p6, %p335_p3 }
  0x12   :  { %345 = shalt.err (!%p342_p7)
}
  0x13   :  { %33 = dma.hbm_to_vmem [thread:$0]  %s546_s1, 128, %s31_s19, [#allocation6]  }
  0x14   :  { %s346_s9 = scalar_lea.hbm %s545_s0, 128 }
  0x15   :  { %p347_p8 = scmp.ne.s32.totalorder %s545_s0, %s346_s9  ;;  %p350_p9 = scmp.lt.u32.totalorder %s346_s9, %s545_s0 }
  0x17   :  { %p352_p10 = pnand %p350_p9, %p347_p8 }
  0x19   :  { %355 = shalt.err (!%p352_p10)
}
  0x1a   :  { %s356_s14 = scalar_lea.vmem %s21_s21, 128  ;;  %p361_p12 = scmp.lt.s32.totalorder %s21_s21, %s21_s21 }
  0x1b   :  { %p357_p11 = scmp.ne.s32.totalorder %s21_s21, %s356_s14  ;;  %p362_p13 = scmp.lt.s32.totalorder %s356_s14, %s356_s14 }
  0x1d   :  { %p363_p0 = por %p362_p13, %p361_p12 }
  0x1f   :  { %p364_p1 = pnand %p363_p0, %p357_p11 }
  0x21   :  { %367 = shalt.err (!%p364_p1)
}
  0x22   :  { %23 = dma.hbm_to_vmem [thread:$0]  %s545_s0, 128, %s21_s21, [#allocation3]  }
  0x23   :  { %s444_s16 = smov [#allocation7]   ;;  %s368_s20 = scalar_lea.hbm %s547_s2, 512 }
  0x24   :  { %s39_s17 = sshll.u32 %s444_s16, 4  ;;  %p369_p2 = scmp.ne.s32.totalorder %s547_s2, %s368_s20  ;;  %s40_s17 = int_to_ptr.vmem [resolvable:$true] %s39_s17 }
  0x25   :  { %p372_p3 = scmp.lt.u32.totalorder %s368_s20, %s547_s2 }
  0x27   :  { %p374_p4 = pnand %p372_p3, %p369_p2 }
  0x29   :  { %377 = shalt.err (!%p374_p4)
}
  0x2a   :  { %s378_s26 = scalar_lea.vmem %s40_s17, 512  ;;  %p383_p6 = scmp.lt.s32.totalorder %s40_s17, %s40_s17 }
  0x2b   :  { %p379_p5 = scmp.ne.s32.totalorder %s40_s17, %s378_s26  ;;  %p384_p7 = scmp.lt.s32.totalorder %s378_s26, %s378_s26 }
  0x2d   :  { %p385_p8 = por %p384_p7, %p383_p6 }
  0x2f   :  { %p386_p9 = pnand %p385_p8, %p379_p5 }
  0x31   :  { %389 = shalt.err (!%p386_p9)
}
  0x32   :  { %s445_s0 = smov 128   ;;  %s446_s21 = smov 8  }
  0x33   :  { %45 = dma.hbm_to_vmem [thread:$0]  %s547_s2, 512, %s40_s17, [#allocation6], %s445_s0, %s445_s0, %s446_s21  }
  0x34   :  { %s447_s29 = smov [#allocation8]   ;;  %s390_s8 = scalar_lea.hbm %s548_s3, 768 }
  0x35   :  { %s51_s30 = sshll.u32 %s447_s29, 4  ;;  %p391_p10 = scmp.ne.s32.totalorder %s548_s3, %s390_s8  ;;  %s52_s30 = int_to_ptr.vmem [resolvable:$true] %s51_s30 }
  0x36   :  { %p394_p11 = scmp.lt.u32.totalorder %s390_s8, %s548_s3 }
  0x38   :  { %p396_p12 = pnand %p394_p11, %p391_p10 }
  0x3a   :  { %399 = shalt.err (!%p396_p12)
}
  0x3b   :  { %s400_s13 = scalar_lea.vmem %s52_s30, 768  ;;  %p405_p0 = scmp.lt.s32.totalorder %s52_s30, %s52_s30 }
  0x3c   :  { %p401_p13 = scmp.ne.s32.totalorder %s52_s30, %s400_s13  ;;  %p406_p1 = scmp.lt.s32.totalorder %s400_s13, %s400_s13 }
  0x3e   :  { %p407_p2 = por %p406_p1, %p405_p0 }
  0x40   :  { %p408_p3 = pnand %p407_p2, %p401_p13 }
  0x42   :  { %411 = shalt.err (!%p408_p3)
}
  0x43   :  { %57 = dma.hbm_to_vmem [thread:$0]  %s548_s3, 768, %s52_s30, [#allocation9], %s445_s0, %s445_s0, %s446_s21  }
  0x44   :  { %434 = dma.done.wait [#allocation3], 128  }
  0x45   :  { %435 = vsyncadd [#allocation3], 4294967168 }
  0x46   :  { %436 = dma.done.wait [#allocation6], 640  }
  0x47   :  { %437 = vsyncadd [#allocation6], 4294966656 }
  0x48   :  { %438 = dma.done.wait [#allocation9], 768  }
  0x49   :  { %439 = vsyncadd [#allocation9], 4294966528  ;;  %v448_v0 = vmov 0.0|0.0   ;;  %vm449_vm0 = vmmov 0   ;;  %v450_v1 = vmov 0.0   ;;  %v78_v2 = vld [vmem:[#allocation8] sm:$0xff] }
  0x4a   :  { %299 = vmatprep.subr.bf16.mxu0 %v448_v0  ;;  %308 = vmatprep.subr.bf16.mxu1 %v448_v0  ;;  %v79_v3 = vld [vmem:[#allocation8 + $0x8] sm:$0xff]  ;;  %v73_v4 = vld [vmem:[#allocation7] sm:$0xff]  ;;  %v80_v7 = vld [vmem:[#allocation8 + $0x10] sm:$0xff]  ;;  %vm158_vm1 = vcmask 261120   ;;  %vm84_vm2 = vcmask 392192   ;;  %s451_s15 = smov [#allocation10]  }
  0x4b   :  { %296 = vmatprep.mubr.msk.f32.mxu1 %vm449_vm0, %v450_v1  ;;  %285 = vmatprep.mubr.msk.f32.mxu0 %vm449_vm0, %v450_v1  ;;  %v300_v5 = vpack.c.bf16 %v79_v3, %v78_v2  ;;  %v74_v6 = vld [vmem:[#allocation7 + $0x8] sm:$0xff]  ;;  %v81_v8 = vld [vmem:[#allocation8 + $0x18] sm:$0xff]  ;;  %v75_v10 = vld [vmem:[#allocation7 + $0x10] sm:$0xff]  ;;  %s247_s16 = sshll.u32 %s451_s15, 4  ;;  %s248_s16 = int_to_ptr.vmem [resolvable:$true] %s247_s16 }
  0x4c   :  { %v309_v9 = vpack.c.bf16 %v74_v6, %v73_v4  ;;  %v76_v11 = vld [vmem:[#allocation7 + $0x18] sm:$0xff]  ;;  %v303_v12 = vpack.c.bf16 %v81_v8, %v80_v7  ;;  %v82_v14 = vld [vmem:[#allocation8 + $0x20] sm:$0xff]  ;;  %v83_v15 = vld [vmem:[#allocation8 + $0x28] sm:$0xff]  ;;  %s412_s17 = scalar_lea.vmem %s248_s16, 128  ;;  %p417_p5 = scmp.lt.s32.totalorder %s248_s16, %s248_s16 }
  0x4d   :  { %301 = vmatpush3.bf16.msra.mxu0 %v300_v5  ;;  %v312_v13 = vpack.c.bf16 %v76_v11, %v75_v10  ;;  %v306_v16 = vpack.c.bf16 %v83_v15, %v82_v14  ;;  %v72_v17 = vld [vmem:[#allocation2] sm:$0xff]  ;;  %v77_v18 = vld [vmem:[#allocation5] sm:$0xff]  ;;  %p413_p4 = scmp.ne.s32.totalorder %s248_s16, %s412_s17  ;;  %p418_p6 = scmp.lt.s32.totalorder %s412_s17, %s412_s17 }
  0x4e   :  { %302 = vmatprep.subr.bf16.mxu0 %v448_v0  ;;  %310 = vmatpush3.bf16.msra.mxu1 %v309_v9  ;;  %v260_v22 = vld [vmem:[%s549_s4] ss:$0 sm:$0xff] }
  0x4f   :  { %311 = vmatprep.subr.bf16.mxu1 %v448_v0  ;;  %p419_p7 = por %p418_p6, %p417_p5 }
  0x51   :  { %304 = vmatpush3.bf16.msra.mxu0 %v303_v12  ;;  %p420_p8 = pnand %p419_p7, %p413_p4 }
  0x52   :  { %305 = vmatprep.subr.bf16.mxu0 %v448_v0  ;;  %313 = vmatpush3.bf16.msra.mxu1 %v312_v13 }
  0x55   :  { %307 = vmatpush3.bf16.msra.mxu0 %v306_v16  ;;  %297 = vmatmul.mubr.msk.f32.vlgmr.msra.gmra.mrb[0].mxu1 %vm158_vm1, %v72_v17 }
  0x58   :  { %286 = vmatmul.mubr.msk.f32.vlgmr.msra.gmra.mrb[0].mxu0 %vm84_vm2, %v77_v18 }
 0x128   :  { %v228_v19 = vpop.f32.mrb[0].mxu1 }
 0x129   :  { %v298_v20 = vpop.f32.mrb[1].mxu1 }
 0x12b   :  { %v154_v21 = vpop.f32.mrb[0].mxu0 }
 0x12c   :  { %v229_v23 = vadd.f32 %v228_v19, %v154_v21  ;;  %v287_v24 = vpop.f32.mrb[1].mxu0 }
 0x12e   :  { %v239_v25 = vadd.f32 %v260_v22, %v229_v23 }
 0x130   :  { %240 = vst [vmem:[#allocation10] sm:$0xff] %v239_v25 }
 0x131   :  { %423 = shalt.err (!%p420_p8)
}
 0x132   :  { %s424_s20 = scalar_lea.hbm %s550_s5, 128 }
 0x133   :  { %p425_p9 = scmp.ne.s32.totalorder %s550_s5, %s424_s20  ;;  %p428_p10 = scmp.lt.u32.totalorder %s424_s20, %s550_s5 }
 0x135   :  { %p430_p11 = pnand %p428_p10, %p425_p9 }
 0x137   :  { %433 = shalt.err (!%p430_p11)
}
 0x138   :  { %250 = dma.vmem_to_hbm [thread:$0]  %s248_s16, 128, %s550_s5, [#allocation4]  }
 0x139   :  { %440 = dma.done.wait [#allocation4], 128  }
 0x13a   :  { %441 = vsyncadd [#allocation4], 4294967168 }
 0x13b   :  { %254 = vsyncpa [#allocation3], 1 }
 0x13c   :  { %255 = vsyncpa [#allocation6], 1 }
 0x13d   :  { %256 = vsyncpa [#allocation9], 1 }
 0x13e   :  { %257 = vsyncpa [#allocation4], 1 }

</bundles_post_ra>
